<compile_context>
chip_gen: v7x
topology: tpu7x:2x2x1
jax: 0.10.0
libtpu: 0.0.40
codegen_flags: <defaults>
</compile_context>

<pallas_src>
import functools

import jax
import jax.numpy as jnp
from jax.experimental import pallas as pl
from jax.experimental.pallas import tpu as pltpu

INPUT_DIM = 5
HIDDEN = 256
OUT_DIM = 3
OUT_PAD = 128          # lane-dense padded head width
DEFAULT_TILE_B = 512   # batch tile (clamped down for small batches)


def _round_up(x, m):
    return ((x + m - 1) // m) * m


def mlp_kernel(x_ref, w1_ref, b1_ref, w2_ref, b2_ref, w3_ref, b3_ref, o_ref):
    # Layer 1: Linear(5 -> 256) + ReLU   (bf16 inputs, f32 accumulate)
    h1 = jnp.dot(x_ref[...], w1_ref[...], preferred_element_type=jnp.float32)
    h1 = jnp.maximum(h1 + b1_ref[...], 0.0)
    # Layer 2: Linear(256 -> 256) + ReLU
    h2 = jnp.dot(h1.astype(jnp.bfloat16), w2_ref[...],
                 preferred_element_type=jnp.float32)
    h2 = jnp.maximum(h2 + b2_ref[...], 0.0)
    # Head: Linear(256 -> 128 padded); true outputs live in lanes [0:3]
    out = jnp.dot(h2.astype(jnp.bfloat16), w3_ref[...],
                  preferred_element_type=jnp.float32) + b3_ref[...]
    o_ref[...] = out.astype(o_ref.dtype)


@functools.partial(jax.jit, static_argnames=("tile_b",))
def predictive_model_forward(x, params, tile_b=DEFAULT_TILE_B):
    """x: (B, INPUT_DIM) float32. params: dict of f32 weights (stored (in, out)) / biases."""
    B = x.shape[0]

    # Clamp the batch tile for small batches; keep it a multiple of 8 (sublane).
    tile_b = min(tile_b, _round_up(B, 8))
    B_pad = _round_up(B, tile_b)

    # Pad batch so the grid divides evenly.
    x_p = x if B_pad == B else jnp.pad(x, ((0, B_pad - B), (0, 0)))
    x_bf = x_p.astype(jnp.bfloat16)

    # bf16 weights (halves DMA bytes, native MXU dtype); f32 biases.
    w1 = params["w1"].astype(jnp.bfloat16)
    w2 = params["w2"].astype(jnp.bfloat16)
    b1 = params["b1"]
    b2 = params["b2"]
    # Zero-pad head to a lane-dense 128-wide output slab.
    w3 = jnp.pad(params["w3"], ((0, 0), (0, OUT_PAD - OUT_DIM))).astype(jnp.bfloat16)
    b3 = jnp.pad(params["b3"], ((0, 0), (0, OUT_PAD - OUT_DIM)))

    grid = (B_pad // tile_b,)

    flops = 2 * B_pad * (INPUT_DIM * HIDDEN + HIDDEN * HIDDEN + HIDDEN * OUT_PAD)
    bytes_accessed = (
        x_bf.size * 2
        + w1.size * 2 + w2.size * 2 + w3.size * 2
        + b1.size * 4 + b2.size * 4 + b3.size * 4
        + B_pad * OUT_PAD * 4
    )

    out_padded = pl.pallas_call(
        mlp_kernel,
        out_shape=jax.ShapeDtypeStruct((B_pad, OUT_PAD), jnp.float32),
        grid=grid,
        in_specs=[
            pl.BlockSpec((tile_b, INPUT_DIM), lambda i: (i, 0)),   # x tile
            pl.BlockSpec((INPUT_DIM, HIDDEN), lambda i: (0, 0)),   # w1 (resident)
            pl.BlockSpec((1, HIDDEN), lambda i: (0, 0)),           # b1
            pl.BlockSpec((HIDDEN, HIDDEN), lambda i: (0, 0)),      # w2
            pl.BlockSpec((1, HIDDEN), lambda i: (0, 0)),           # b2
            pl.BlockSpec((HIDDEN, OUT_PAD), lambda i: (0, 0)),     # w3 (padded)
            pl.BlockSpec((1, OUT_PAD), lambda i: (0, 0)),          # b3 (padded)
        ],
        out_specs=pl.BlockSpec((tile_b, OUT_PAD), lambda i: (i, 0)),
        compiler_params=pltpu.CompilerParams(
            dimension_semantics=("parallel",),
        ),
        cost_estimate=pl.CostEstimate(
            flops=flops, transcendentals=0, bytes_accessed=bytes_accessed
        ),
    )(x_bf, w1, b1, w2, b2, w3, b3)

    # Strip batch padding and the 125 padded output lanes.
    return out_padded[:B, :OUT_DIM]


def init_params(key, input_dim=INPUT_DIM, hidden_dims=(HIDDEN, HIDDEN), out_dim=OUT_DIM):
    """Deterministic synthetic init (nn.Linear-style, weights stored transposed (in, out))."""
    keys = jax.random.split(key, 6)
    dims = [input_dim] + list(hidden_dims) + [out_dim]
    params = {}
    names = ["w1", "w2", "w3"]
    bnames = ["b1", "b2", "b3"]
    for i, (din, dout) in enumerate(zip(dims[:-1], dims[1:])):
        scale = 1.0 / jnp.sqrt(jnp.float32(din))
        params[names[i]] = jax.random.uniform(
            keys[2 * i], (din, dout), jnp.float32, -scale, scale
        )
        params[bnames[i]] = jax.random.uniform(
            keys[2 * i + 1], (1, dout), jnp.float32, -scale, scale
        )
    return params


def reference_forward(x, params):
    """f32 reference with the same bf16 quantization of MXU inputs as the kernel."""
    xq = x.astype(jnp.bfloat16).astype(jnp.float32)
    w1 = params["w1"].astype(jnp.bfloat16).astype(jnp.float32)
    w2 = params["w2"].astype(jnp.bfloat16).astype(jnp.float32)
    w3 = params["w3"].astype(jnp.bfloat16).astype(jnp.float32)
    h1 = jnp.maximum(xq @ w1 + params["b1"], 0.0)
    h2 = jnp.maximum(h1.astype(jnp.bfloat16).astype(jnp.float32) @ w2 + params["b2"], 0.0)
    return h2.astype(jnp.bfloat16).astype(jnp.float32) @ w3 + params["b3"]


if __name__ == "__main__":
    key = jax.random.PRNGKey(0)
    pkey, xkey = jax.random.split(key)

    params = init_params(pkey)
    x = jax.random.normal(xkey, (8, INPUT_DIM), jnp.float32)  # (batch=8, input_dim=5)

    out = predictive_model_forward(x, params)
    out = jax.block_until_ready(out)

    ref = reference_forward(x, params)
    assert out.shape == (8, OUT_DIM)
    assert jnp.allclose(out, ref, atol=2e-3, rtol=2e-3), (
        float(jnp.max(jnp.abs(out - ref)))
    )

    print("KERNEL_OK")
</pallas_src>

<mosaic_0001>
module attributes {stable_mosaic.version = 11 : i64} {
  func.func @mlp_kernel(%arg0: i32, %arg1: memref<8x5xbf16, #tpu.memory_space<vmem>>, %arg2: memref<5x256xbf16, #tpu.memory_space<vmem>>, %arg3: memref<1x256xf32, #tpu.memory_space<vmem>>, %arg4: memref<256x256xbf16, #tpu.memory_space<vmem>>, %arg5: memref<1x256xf32, #tpu.memory_space<vmem>>, %arg6: memref<256x128xbf16, #tpu.memory_space<vmem>>, %arg7: memref<1x128xf32, #tpu.memory_space<vmem>>, %arg8: memref<8x128xf32, #tpu.memory_space<vmem>>) attributes {dimension_semantics = [#tpu.dimension_semantics<parallel>], iteration_bounds = array<i64: 1>, scalar_prefetch = 0 : i64, scratch_operands = 0 : i64, tpu.core_type = #tpu.core_type<tc>, window_params = [{transform_indices = @transform_0, window_bounds = array<i64: 8, 5>}, {pipeline_mode = #tpu.pipeline_mode<synchronous>, transform_indices = @transform_1, window_bounds = array<i64: 5, 256>}, {pipeline_mode = #tpu.pipeline_mode<synchronous>, transform_indices = @transform_2, window_bounds = array<i64: 1, 256>}, {pipeline_mode = #tpu.pipeline_mode<synchronous>, transform_indices = @transform_3, window_bounds = array<i64: 256, 256>}, {pipeline_mode = #tpu.pipeline_mode<synchronous>, transform_indices = @transform_4, window_bounds = array<i64: 1, 256>}, {pipeline_mode = #tpu.pipeline_mode<synchronous>, transform_indices = @transform_5, window_bounds = array<i64: 256, 128>}, {pipeline_mode = #tpu.pipeline_mode<synchronous>, transform_indices = @transform_6, window_bounds = array<i64: 1, 128>}, {transform_indices = @transform_7, window_bounds = array<i64: 8, 128>}]} {
    %c0 = arith.constant 0 : index
    %c0_0 = arith.constant 0 : index
    %0 = vector.load %arg1[%c0, %c0_0] : memref<8x5xbf16, #tpu.memory_space<vmem>>, vector<8x5xbf16>
    %c0_1 = arith.constant 0 : index
    %c0_2 = arith.constant 0 : index
    %1 = vector.load %arg2[%c0_1, %c0_2] : memref<5x256xbf16, #tpu.memory_space<vmem>>, vector<5x256xbf16>
    %cst = arith.constant dense<0.000000e+00> : vector<8x256xf32>
    %2 = tpu.matmul %0, %1, %cst {dimension_numbers = #tpu.dot_dimension_numbers<[1], [0], [0], [1], [0, 0, 1, 1], [], []>} : vector<8x5xbf16>, vector<5x256xbf16>, vector<8x256xf32> -> vector<8x256xf32>
    %c0_3 = arith.constant 0 : index
    %c0_4 = arith.constant 0 : index
    %3 = vector.load %arg3[%c0_3, %c0_4] : memref<1x256xf32, #tpu.memory_space<vmem>>, vector<1x256xf32>
    %4 = vector.broadcast %3 : vector<1x256xf32> to vector<8x256xf32>
    %5 = arith.addf %2, %4 : vector<8x256xf32>
    %cst_5 = arith.constant 0.000000e+00 : f32
    %6 = vector.broadcast %cst_5 : f32 to vector<8x256xf32>
    %7 = arith.maximumf %5, %6 : vector<8x256xf32>
    %8 = arith.truncf %7 : vector<8x256xf32> to vector<8x256xbf16>
    %c0_6 = arith.constant 0 : index
    %c0_7 = arith.constant 0 : index
    %9 = vector.load %arg4[%c0_6, %c0_7] : memref<256x256xbf16, #tpu.memory_space<vmem>>, vector<256x256xbf16>
    %cst_8 = arith.constant dense<0.000000e+00> : vector<8x256xf32>
    %10 = tpu.matmul %8, %9, %cst_8 {dimension_numbers = #tpu.dot_dimension_numbers<[1], [0], [0], [1], [0, 0, 1, 1], [], []>} : vector<8x256xbf16>, vector<256x256xbf16>, vector<8x256xf32> -> vector<8x256xf32>
    %c0_9 = arith.constant 0 : index
    %c0_10 = arith.constant 0 : index
    %11 = vector.load %arg5[%c0_9, %c0_10] : memref<1x256xf32, #tpu.memory_space<vmem>>, vector<1x256xf32>
    %12 = vector.broadcast %11 : vector<1x256xf32> to vector<8x256xf32>
    %13 = arith.addf %10, %12 : vector<8x256xf32>
    %cst_11 = arith.constant 0.000000e+00 : f32
    %14 = vector.broadcast %cst_11 : f32 to vector<8x256xf32>
    %15 = arith.maximumf %13, %14 : vector<8x256xf32>
    %16 = arith.truncf %15 : vector<8x256xf32> to vector<8x256xbf16>
    %c0_12 = arith.constant 0 : index
    %c0_13 = arith.constant 0 : index
    %17 = vector.load %arg6[%c0_12, %c0_13] : memref<256x128xbf16, #tpu.memory_space<vmem>>, vector<256x128xbf16>
    %cst_14 = arith.constant dense<0.000000e+00> : vector<8x128xf32>
    %18 = tpu.matmul %16, %17, %cst_14 {dimension_numbers = #tpu.dot_dimension_numbers<[1], [0], [0], [1], [0, 0, 1, 1], [], []>} : vector<8x256xbf16>, vector<256x128xbf16>, vector<8x128xf32> -> vector<8x128xf32>
    %c0_15 = arith.constant 0 : index
    %c0_16 = arith.constant 0 : index
    %19 = vector.load %arg7[%c0_15, %c0_16] : memref<1x128xf32, #tpu.memory_space<vmem>>, vector<1x128xf32>
    %20 = vector.broadcast %19 : vector<1x128xf32> to vector<8x128xf32>
    %21 = arith.addf %18, %20 : vector<8x128xf32>
    %c0_17 = arith.constant 0 : index
    %c0_18 = arith.constant 0 : index
    %22 = vector.load %arg8[%c0_17, %c0_18] : memref<8x128xf32, #tpu.memory_space<vmem>>, vector<8x128xf32>
    tpu.vector_store %arg8[%c0_17, %c0_18], %21 {strides = array<i32>} : memref<8x128xf32, #tpu.memory_space<vmem>>, vector<8x128xf32>,
    return
  }
  func.func @transform_0(%arg0: i32) -> (i32, i32) {
    %c0_i32 = arith.constant 0 : i32
    %c0_i32_0 = arith.constant 0 : i32
    return %arg0, %c0_i32 : i32, i32
  }
  func.func @transform_1(%arg0: i32) -> (i32, i32) {
    %c0_i32 = arith.constant 0 : i32
    %c0_i32_0 = arith.constant 0 : i32
    %c0_i32_1 = arith.constant 0 : i32
    return %c0_i32, %c0_i32_0 : i32, i32
  }
  func.func @transform_2(%arg0: i32) -> (i32, i32) {
    %c0_i32 = arith.constant 0 : i32
    %c0_i32_0 = arith.constant 0 : i32
    %c0_i32_1 = arith.constant 0 : i32
    return %c0_i32, %c0_i32_0 : i32, i32
  }
  func.func @transform_3(%arg0: i32) -> (i32, i32) {
    %c0_i32 = arith.constant 0 : i32
    %c0_i32_0 = arith.constant 0 : i32
    %c0_i32_1 = arith.constant 0 : i32
    return %c0_i32, %c0_i32_0 : i32, i32
  }
  func.func @transform_4(%arg0: i32) -> (i32, i32) {
    %c0_i32 = arith.constant 0 : i32
    %c0_i32_0 = arith.constant 0 : i32
    %c0_i32_1 = arith.constant 0 : i32
    return %c0_i32, %c0_i32_0 : i32, i32
  }
  func.func @transform_5(%arg0: i32) -> (i32, i32) {
    %c0_i32 = arith.constant 0 : i32
    %c0_i32_0 = arith.constant 0 : i32
    %c0_i32_1 = arith.constant 0 : i32
    return %c0_i32, %c0_i32_0 : i32, i32
  }
  func.func @transform_6(%arg0: i32) -> (i32, i32) {
    %c0_i32 = arith.constant 0 : i32
    %c0_i32_0 = arith.constant 0 : i32
    %c0_i32_1 = arith.constant 0 : i32
    return %c0_i32, %c0_i32_0 : i32, i32
  }
  func.func @transform_7(%arg0: i32) -> (i32, i32) {
    %c0_i32 = arith.constant 0 : i32
    %c0_i32_0 = arith.constant 0 : i32
    return %arg0, %c0_i32 : i32, i32
  }
}

</mosaic_0001>

<bundles_post_ra>
// kernel: predictive_model_forward.1
= control target key start
LH: loop header
LB: loop body
LE: loop exit
PB: predicated region body
PF: predicated region fallthrough
CT: control target
= control target key end

     0   :  { %vm50_vm0 = vcmask 1041408   ;;  %vm51_vm1 = vcmask 1042432   ;;  %v676_v1 = vmov 65535   ;;  %v677_v3 = vmov 0   ;;  %s880_s1 = inlined_call_operand.vmem [shape: bf16[5,256], index: 1, kind: input, shape index: {}]   ;;  %s881_s3 = inlined_call_operand.vmem [shape: bf16[256,256], index: 3, kind: input, shape index: {}]   ;;  %s882_s0 = inlined_call_operand.vmem [shape: bf16[8,5], index: 0, kind: input, shape index: {}]   ;;  %s883_s5 = inlined_call_operand.vmem [shape: bf16[256,128], index: 5, kind: input, shape index: {}]   ;;  %s884_s2 = inlined_call_operand.vmem [shape: f32[1,256], index: 2, kind: input, shape index: {}]   ;;  %s885_s4 = inlined_call_operand.vmem [shape: f32[1,256], index: 4, kind: input, shape index: {}]   ;;  %s886_s6 = inlined_call_operand.vmem [shape: f32[1,128], index: 6, kind: input, shape index: {}]   ;;  %s887_s7 = inlined_call_operand.vmem [shape: f32[8,128], index: 7, kind: output, shape index: {}]  }
   0x1   :  { %v28_v0 = vld [vmem:[%s880_s1] sm:$0x77]  ;;  %v52_v2 = vsel %vm50_vm0, 4294967295, %v676_v1  ;;  %92 = vmatprep.mubr.bf16.mxu0 %v677_v3  ;;  %v615_v11 = vld [vmem:[%s881_s3 + $0x14] ss:$8 sps:$4 sm:$0xff]   ;;  %vm46_vm2 = vcmask 39936   ;;  %v31_v54 = vlaneseq }
   0x2   :  { %v535_v4 = vcombine.high %v28_v0, %v28_v0  ;;  %v53_v5 = vsel %vm51_vm1, %v52_v2, 0  ;;  %v534_v6 = vcombine.low %v28_v0, %v28_v0  ;;  %v612_v7 = vld [vmem:[%s881_s3 + $0x4] ss:$8 sps:$4 sm:$0xff]   ;;  %v614_v8 = vld [vmem:[%s881_s3] ss:$8 sps:$4 sm:$0xff]   ;;  %v664_v46 = vld [vmem:[%s883_s5 + $0x50] sm:$0xff]  }
   0x3   :  { %309 = vmatprep.subr.bf16.mxu1 %v612_v7  ;;  %v617_v12 = vld [vmem:[%s881_s3 + $0x10] ss:$8 sps:$4 sm:$0xff]   ;;  %v618_v13 = vld [vmem:[%s881_s3 + $0x24] ss:$8 sps:$4 sm:$0xff]   ;;  %v27_v14 = vld [vmem:[%s882_s0] sm:$0xf] }
   0x4   :  { %v58_v9 = vand.u32 %v535_v4, %v53_v5  ;;  %v55_v10 = vand.u32 %v534_v6, %v53_v5  ;;  %310 = vmatpush1.bf16.msra.mxu1 %v614_v8  ;;  %v620_v15 = vld [vmem:[%s881_s3 + $0x20] ss:$8 sps:$4 sm:$0xff]   ;;  %v621_v16 = vld [vmem:[%s881_s3 + $0x34] ss:$8 sps:$4 sm:$0xff]   ;;  %v623_v17 = vld [vmem:[%s881_s3 + $0x30] ss:$8 sps:$4 sm:$0xff]  }
   0x5   :  { %311 = vmatprep.subr.bf16.mxu1 %v615_v11  ;;  %v624_v18 = vld [vmem:[%s881_s3 + $0x44] ss:$8 sps:$4 sm:$0xff]   ;;  %v626_v19 = vld [vmem:[%s881_s3 + $0x40] ss:$8 sps:$4 sm:$0xff]   ;;  %v627_v20 = vld [vmem:[%s881_s3 + $0x54] ss:$8 sps:$4 sm:$0xff]  }
   0x6   :  { %60 = vmatprep.subr.bf16.mxu0 %v58_v9  ;;  %v629_v21 = vld [vmem:[%s881_s3 + $0x50] ss:$8 sps:$4 sm:$0xff]   ;;  %v630_v22 = vld [vmem:[%s881_s3 + $0x64] ss:$8 sps:$4 sm:$0xff]   ;;  %v632_v23 = vld [vmem:[%s881_s3 + $0x60] ss:$8 sps:$4 sm:$0xff]  }
   0x7   :  { %61 = vmatpush1.bf16.msra.mxu0 %v55_v10  ;;  %v633_v24 = vld [vmem:[%s881_s3 + $0x74] ss:$8 sps:$4 sm:$0xff]   ;;  %v635_v25 = vld [vmem:[%s881_s3 + $0x70] ss:$8 sps:$4 sm:$0xff]   ;;  %v636_v26 = vld [vmem:[%s881_s3 + $0x84] ss:$8 sps:$4 sm:$0xff]  }
   0x8   :  { %312 = vmatpush1.bf16.msra.mxu1 %v617_v12  ;;  %v638_v27 = vld [vmem:[%s881_s3 + $0x80] ss:$8 sps:$4 sm:$0xff]   ;;  %v639_v28 = vld [vmem:[%s881_s3 + $0x94] ss:$8 sps:$4 sm:$0xff]   ;;  %v641_v29 = vld [vmem:[%s881_s3 + $0x90] ss:$8 sps:$4 sm:$0xff]  }
   0x9   :  { %313 = vmatprep.subr.bf16.mxu1 %v618_v13  ;;  %v642_v30 = vld [vmem:[%s881_s3 + $0xa4] ss:$8 sps:$4 sm:$0xff]   ;;  %v644_v31 = vld [vmem:[%s881_s3 + $0xa0] ss:$8 sps:$4 sm:$0xff]   ;;  %v645_v32 = vld [vmem:[%s881_s3 + $0xb4] ss:$8 sps:$4 sm:$0xff]  }
   0xa   :  { %536 = vmatmul.mubr.msk.bf16.vlgmr.msra.gmra.mrb[0].mxu0 %vm46_vm2, %v27_v14  ;;  %v647_v33 = vld [vmem:[%s881_s3 + $0xb0] ss:$8 sps:$4 sm:$0xff]   ;;  %v648_v34 = vld [vmem:[%s881_s3 + $0xc4] ss:$8 sps:$4 sm:$0xff]   ;;  %v650_v35 = vld [vmem:[%s881_s3 + $0xc0] ss:$8 sps:$4 sm:$0xff]  }
   0xb   :  { %v651_v36 = vld [vmem:[%s881_s3 + $0xd4] ss:$8 sps:$4 sm:$0xff]   ;;  %v653_v37 = vld [vmem:[%s881_s3 + $0xd0] ss:$8 sps:$4 sm:$0xff]   ;;  %v654_v38 = vld [vmem:[%s881_s3 + $0xe4] ss:$8 sps:$4 sm:$0xff]  }
   0xc   :  { %314 = vmatpush1.bf16.msra.mxu1 %v620_v15  ;;  %v656_v39 = vld [vmem:[%s881_s3 + $0xe0] ss:$8 sps:$4 sm:$0xff]   ;;  %v657_v40 = vld [vmem:[%s881_s3 + $0xf4] ss:$8 sps:$4 sm:$0xff]   ;;  %v659_v41 = vld [vmem:[%s881_s3 + $0xf0] ss:$8 sps:$4 sm:$0xff]  }
   0xd   :  { %315 = vmatprep.subr.bf16.mxu1 %v621_v16  ;;  %v660_v42 = vld [vmem:[%s883_s5 + $0x40] sm:$0xff]   ;;  %v662_v44 = vld [vmem:[%s883_s5 + $0x48] sm:$0xff]   ;;  %v665_v47 = vld [vmem:[%s883_s5 + $0x10] sm:$0xff]   ;;  %v32_v55 = vshrl.u32 %v31_v54, 7 }
   0xe   :  { %v661_v43 = vld [vmem:[%s883_s5] sm:$0xff]   ;;  %586 = vmatprep.subr.bf16.mxu0 %v660_v42  ;;  %v663_v45 = vld [vmem:[%s883_s5 + $0x8] sm:$0xff]   ;;  %v666_v48 = vld [vmem:[%s883_s5 + $0x58] sm:$0xff]  }
   0xf   :  { %587 = vmatpush3.bf16.msra.mxu0 %v661_v43  ;;  %v667_v49 = vld [vmem:[%s883_s5 + $0x18] sm:$0xff]   ;;  %v668_v50 = vld [vmem:[%s883_s5 + $0x60] sm:$0xff]   ;;  %v670_v52 = vld [vmem:[%s883_s5 + $0x68] sm:$0xff]   ;;  %v33_v56 = vsub.s32 0, %v32_v55  ;;  %v37_v58 = vsub.s32 1, %v32_v55 }
  0x10   :  { %316 = vmatpush1.bf16.msra.mxu1 %v623_v17  ;;  %588 = vmatprep.subr.bf16.mxu0 %v662_v44  ;;  %v669_v51 = vld [vmem:[%s883_s5 + $0x20] sm:$0xff]   ;;  %v671_v53 = vld [vmem:[%s883_s5 + $0x28] sm:$0xff]   ;;  %v672_v7 = vld [vmem:[%s883_s5 + $0x70] sm:$0xff]  }
  0x11   :  { %317 = vmatprep.subr.bf16.mxu1 %v624_v18  ;;  %v29_v57 = vld [vmem:[%s884_s2] sm:$0x3]  ;;  %v673_v8 = vld [vmem:[%s883_s5 + $0x30] sm:$0xff]   ;;  %v674_v9 = vld [vmem:[%s883_s5 + $0x78] sm:$0xff]  }
  0x12   :  { %v34_v59 = vrot.slane %v29_v57, %v33_v56  ;;  %v38_v60 = vrot.slane %v29_v57, %v37_v58  ;;  %v675_v10 = vld [vmem:[%s883_s5 + $0x38] sm:$0xff]   ;;  %v137_v11 = vld [vmem:[%s885_s4] sm:$0x3] }
  0x13   :  { %589 = vmatpush3.bf16.msra.mxu0 %v663_v45  ;;  %v142_v12 = vrot.slane %v137_v11, %v33_v56  ;;  %v146_v13 = vrot.slane %v137_v11, %v37_v58 }
  0x14   :  { %318 = vmatpush1.bf16.msra.mxu1 %v626_v19  ;;  %590 = vmatprep.subr.bf16.mxu0 %v664_v46 }
  0x15   :  { %319 = vmatprep.subr.bf16.mxu1 %v627_v20 }
  0x17   :  { %591 = vmatpush3.bf16.msra.mxu0 %v665_v47 }
  0x18   :  { %320 = vmatpush1.bf16.msra.mxu1 %v629_v21  ;;  %592 = vmatprep.subr.bf16.mxu0 %v666_v48 }
  0x19   :  { %321 = vmatprep.subr.bf16.mxu1 %v630_v22 }
  0x1b   :  { %593 = vmatpush3.bf16.msra.mxu0 %v667_v49 }
  0x1c   :  { %322 = vmatpush1.bf16.msra.mxu1 %v632_v23  ;;  %594 = vmatprep.subr.bf16.mxu0 %v668_v50 }
  0x1d   :  { %323 = vmatprep.subr.bf16.mxu1 %v633_v24 }
  0x1f   :  { %595 = vmatpush3.bf16.msra.mxu0 %v669_v51 }
  0x20   :  { %324 = vmatpush1.bf16.msra.mxu1 %v635_v25  ;;  %596 = vmatprep.subr.bf16.mxu0 %v670_v52  ;;  %v569_v25 = vld [vmem:[%s886_s6] ss:$0 sm:$0xff] }
  0x21   :  { %325 = vmatprep.subr.bf16.mxu1 %v636_v26 }
  0x23   :  { %597 = vmatpush3.bf16.msra.mxu0 %v671_v53 }
  0x24   :  { %326 = vmatpush1.bf16.msra.mxu1 %v638_v27  ;;  %598 = vmatprep.subr.bf16.mxu0 %v672_v7 }
  0x25   :  { %327 = vmatprep.subr.bf16.mxu1 %v639_v28 }
  0x27   :  { %599 = vmatpush3.bf16.msra.mxu0 %v673_v8 }
  0x28   :  { %328 = vmatpush1.bf16.msra.mxu1 %v641_v29  ;;  %600 = vmatprep.subr.bf16.mxu0 %v674_v9 }
  0x29   :  { %329 = vmatprep.subr.bf16.mxu1 %v642_v30 }
  0x2b   :  { %601 = vmatpush3.bf16.msra.mxu0 %v675_v10 }
  0x2c   :  { %330 = vmatpush1.bf16.msra.mxu1 %v644_v31 }
  0x2d   :  { %331 = vmatprep.subr.bf16.mxu1 %v645_v32 }
  0x30   :  { %332 = vmatpush1.bf16.msra.mxu1 %v647_v33 }
  0x31   :  { %333 = vmatprep.subr.bf16.mxu1 %v648_v34 }
  0x34   :  { %334 = vmatpush1.bf16.msra.mxu1 %v650_v35 }
  0x35   :  { %335 = vmatprep.subr.bf16.mxu1 %v651_v36 }
  0x38   :  { %336 = vmatpush1.bf16.msra.mxu1 %v653_v37 }
  0x39   :  { %337 = vmatprep.subr.bf16.mxu1 %v654_v38 }
  0x3c   :  { %338 = vmatpush1.bf16.msra.mxu1 %v656_v39 }
  0x3d   :  { %339 = vmatprep.subr.bf16.mxu1 %v657_v40 }
  0x40   :  { %340 = vmatpush1.bf16.msra.mxu1 %v659_v41 }
  0xdd   :  { %v94_v61 = vpop.f32.mrb[0].mxu0 }
  0xde   :  { %v95_v62 = vadd.f32 %v94_v61, %v34_v59  ;;  %v96_v63 = vpop.f32.mrb[1].mxu0 }
  0xdf   :  { %v97_v0 = vadd.f32 %v96_v63, %v38_v60  ;;  %v98_v1 = vpop.f32.mrb[2].mxu0 }
  0xe0   :  { %v101_v2 = vmax.f32 %v95_v62, 0.0  ;;  %v99_v3 = vpop.f32.mrb[3].mxu0 }
  0xe1   :  { %v102_v4 = vmax.f32 %v97_v0, 0.0 }
  0xe2   :  { %v103_v6 = vpack.c.bf16 %v101_v2, %v101_v2 }
  0xe3   :  { %v104_v5 = vpack.c.bf16 %v102_v4, %v102_v4 }
  0xe5   :  { %341 = vmatprep.mubr.bf16.mxu1 %v104_v5 }
  0xe6   :  { %342 = vmatmul.mubr.bf16.vlgmr.msra.gmra.mrb[0].mxu1 %v103_v6 }
 0x1b9   :  { %v343_v14 = vpop.f32.mrb[0].mxu1 }
 0x1ba   :  { %v344_v15 = vadd.f32 %v343_v14, %v142_v12  ;;  %v345_v16 = vpop.f32.mrb[1].mxu1 }
 0x1bb   :  { %v346_v17 = vadd.f32 %v345_v16, %v146_v13  ;;  %v347_v18 = vpop.f32.mrb[2].mxu1 }
 0x1bc   :  { %v350_v19 = vmax.f32 %v344_v15, 0.0  ;;  %v348_v20 = vpop.f32.mrb[3].mxu1 }
 0x1bd   :  { %v351_v21 = vmax.f32 %v346_v17, 0.0 }
 0x1be   :  { %v352_v23 = vpack.c.bf16 %v350_v19, %v350_v19 }
 0x1bf   :  { %v353_v22 = vpack.c.bf16 %v351_v21, %v351_v21 }
 0x1c1   :  { %521 = vmatprep.mubr.bf16.mxu0 %v353_v22 }
 0x1c2   :  { %522 = vmatmul.mubr.bf16.vlgmr.msra.gmra.mrb[4].mxu0 %v352_v23 }
 0x295   :  { %v602_v24 = vpop.f32.mrb[4].mxu0 }
 0x296   :  { %v603_v26 = vpop.f32.mrb[5].mxu0 }
 0x297   :  { %v604_v27 = vadd.f32 %v603_v26, %v602_v24  ;;  %v605_v28 = vpop.f32.mrb[6].mxu0 }
 0x298   :  { %v606_v29 = vpop.f32.mrb[7].mxu0 }
 0x299   :  { %v524_v30 = vadd.f32 %v604_v27, %v569_v25 }
 0x29b   :  { %529 = vst [vmem:[%s887_s7] sm:$0xff] %v524_v30 }

</bundles_post_ra>
